<compile_context>
chip_gen: v5e
topology: v5e:2x2
jax: 0.10.0
libtpu: 0.0.40
codegen_flags: <defaults>
</compile_context>

<pallas_src>
import numpy as np
import jax
import jax.numpy as jnp
from jax.experimental import pallas as pl
from jax.experimental.pallas import tpu as pltpu

SIZE = 32          # TreeRNN hidden size -> output_size = 2 * SIZE
EMBED_DIM = 16     # embed.output_size (= TreeRNN.input_size)
VOCAB = 20
LEVEL_ALIGN = 16   # per-level row padding (bf16 sublane packing = 16 rows)


# ------------------------------ Pallas kernel -------------------------------

def _make_tree_kernel(level_off, level_cnt, size):
    """Fused inside+outside TreeRNN recurrence over level-sliced row blocks."""
    num_levels = len(level_cnt)
    S = size

    def kernel(feat_ref, c_ref, p_ref, w_in_t_ref, w_out_t_ref,
               h_ref, zc_ref, csz_ref):
        # zc_ref : (Np, S)   bf16  z_children            (RHS of the C matmuls)
        # csz_ref: (Np, 2*S) bf16  [child_sum | z_parent] (fused RHS of P matmuls)
        w_in_t = w_in_t_ref[...]       # (S, S) = W_in^T   (pre-transposed)
        w_out_t = w_out_t_ref[...]     # (S, S) = W_out^T  (pre-transposed)

        # Zero-init the bf16 state: rows never written (global padding) must not
        # feed stale VMEM (0 * NaN) into the adjacency matmuls.
        zc_ref[...] = jnp.zeros_like(zc_ref)
        csz_ref[...] = jnp.zeros_like(csz_ref)

        # ---------------- inside pass (deepest level -> roots) ----------------
        for d in range(num_levels - 1, -1, -1):
            rows = pl.ds(level_off[d], level_cnt[d])
            # Children of a depth-d node all sit at depth d+1 and were written
            # on the previous iteration; bf16 x bf16 -> f32 acc on the MXU.
            cs = jnp.dot(c_ref[rows, :], zc_ref[...],
                         preferred_element_type=jnp.float32)
            z_in = jnp.tanh(jnp.dot(cs, w_in_t,
                                    preferred_element_type=jnp.float32))
            # Leaves / padded rows: cs == 0 -> z_in == 0 -> zc = tanh(feat),
            # ctxt_inside = 0, exactly matching compute_z_ctxt_for_inside.
            zc_new = jnp.tanh(feat_ref[rows, :] + z_in)
            zc_ref[rows, :] = zc_new.astype(jnp.bfloat16)
            csz_ref[rows, 0:S] = cs.astype(jnp.bfloat16)   # stash child sums
            h_ref[rows, 0:S] = z_in                        # z_ctxt_inside

        # ---------------- outside pass (roots -> deepest level) ---------------
        rows0 = pl.ds(level_off[0], level_cnt[0])
        zp_root = jnp.tanh(feat_ref[rows0, :])
        csz_ref[rows0, S:2 * S] = zp_root.astype(jnp.bfloat16)
        h_ref[rows0, S:2 * S] = jnp.zeros_like(zp_root)    # ctxt_out(root) = 0

        for d in range(1, num_levels):
            rows = pl.ds(level_off[d], level_cnt[d])
            # Shared-LHS fusion: one 64-lane-RHS matmul yields both the parent's
            # child-sum and the parent's z_parent (parents live at depth d-1).
            both = jnp.dot(p_ref[rows, :], csz_ref[...],
                           preferred_element_type=jnp.float32)
            pcs = both[:, 0:S]          # sum of z_children over siblings + self
            zpp = both[:, S:2 * S]      # parent z_parent
            zc_self = zc_ref[rows, :].astype(jnp.float32)
            z_in_o = jnp.tanh(jnp.dot(pcs - zc_self, w_in_t,
                                      preferred_element_type=jnp.float32))
            z_out = jnp.tanh(jnp.dot(zpp, w_out_t,
                                     preferred_element_type=jnp.float32) + z_in_o)
            zp_new = jnp.tanh(feat_ref[rows, :] + z_out)
            csz_ref[rows, S:2 * S] = zp_new.astype(jnp.bfloat16)
            h_ref[rows, S:2 * S] = z_out                   # z_ctxt_outside

    return kernel


# -------------------------- host-side graph glue ---------------------------

def _build_graph(tree_parents):
    """Python-side graph metadata (equivalent of dgl.batch of the trees)."""
    children, parent_of, depth, lengths = {}, {}, {}, []
    total = 0
    for parents in tree_parents:
        n = len(parents)
        lengths.append(n)
        off = total
        for i, p in enumerate(parents):
            g = off + i
            children.setdefault(g, [])
            if p < 0:
                parent_of[g] = -1
                depth[g] = 0
            else:
                gp = off + p
                parent_of[g] = gp
                children.setdefault(gp, []).append(g)
                depth[g] = depth[gp] + 1
        total += n
    return children, parent_of, depth, lengths, total


def _build_level_layout(depth, n_nodes):
    """Level-contiguous row layout: each level padded to LEVEL_ALIGN rows."""
    num_levels = (max(depth.values()) + 1) if n_nodes else 1
    levels = [[] for _ in range(num_levels)]
    for v in range(n_nodes):
        levels[depth[v]].append(v)
    level_off, level_cnt = [], []
    row_of_node = np.zeros(n_nodes, np.int32)
    off = 0
    for d in range(num_levels):
        cnt = max(LEVEL_ALIGN,
                  ((len(levels[d]) + LEVEL_ALIGN - 1) // LEVEL_ALIGN) * LEVEL_ALIGN)
        for j, v in enumerate(levels[d]):
            row_of_node[v] = off + j
        level_off.append(off)
        level_cnt.append(cnt)
        off += cnt
    n_pad = ((off + 127) // 128) * 128      # lane-friendly contraction dim
    return level_off, level_cnt, row_of_node, n_pad


# ------------------------------ TreeEncoder --------------------------------

def tree_encoder_forward(params, tree_parents, node_tokens, node_ids):
    emb_table, w_node, w_in, w_out = params
    children, parent_of, depth, lengths, n_nodes = _build_graph(tree_parents)
    level_off, level_cnt, row_of_node, n_pad = _build_level_layout(depth, n_nodes)

    # Static topology -> dense bf16 adjacency in the level-sorted row order.
    # TODO(synk): for very large batched forests replace the dense O(Np^2)
    # adjacency with scalar-prefetched child/parent index tables
    # (PrefetchScalarGridSpec) + segment sums; dense rows are the scaling limit.
    c_mat = np.zeros((n_pad, n_pad), np.float32)
    p_mat = np.zeros((n_pad, n_pad), np.float32)
    for v in range(n_nodes):
        rv = int(row_of_node[v])
        for c in children[v]:
            rc = int(row_of_node[c])
            c_mat[rv, rc] = 1.0     # C[parent, child]
            p_mat[rc, rv] = 1.0     # P[child, parent]
    c_bf = jnp.asarray(c_mat, jnp.bfloat16)     # 0/1 are exact in bf16
    p_bf = jnp.asarray(p_mat, jnp.bfloat16)

    # node_features = W_node(embed(tokens)); a (20,16)@(16,32) matmul is far
    # below kernel-launch overhead, so it stays in plain XLA (gather + matmul).
    proj_table = jnp.dot(emb_table, jnp.transpose(w_node))       # (VOCAB, SIZE)
    node_features = proj_table[node_tokens]                      # (N, SIZE)
    rows_idx = jnp.asarray(row_of_node, jnp.int32)
    feat = jnp.zeros((n_pad, SIZE), jnp.float32).at[rows_idx].set(node_features)

    # VMEM budgeting: only raise the scoped limit when the adjacency needs it.
    vmem_need = (2 * n_pad * n_pad * 2                 # C, P (bf16)
                 + n_pad * SIZE * 4                    # feat
                 + n_pad * 2 * SIZE * 4                # output h
                 + n_pad * SIZE * 2 + n_pad * 2 * SIZE * 2   # bf16 scratch
                 + (2 << 20))
    compiler_params = None
    if vmem_need > (24 << 20):
        # TODO(synk): on v7x (64 MiB VMEM) keep C/P HBM-resident
        # (memory_space=pl.ANY) and double-buffer per-level row slices with
        # pltpu.make_async_copy instead of just raising the scoped limit.
        compiler_params = pltpu.CompilerParams(
            vmem_limit_bytes=int(min(vmem_need, 100 << 20)))

    # TODO(synk): on v7x split the (block-diagonal) batched forest across both
    # TensorCores via a 2-wide parallel grid / pl.core_map; trees are independent.
    h_pad = pl.pallas_call(
        _make_tree_kernel(level_off, level_cnt, SIZE),
        out_shape=jax.ShapeDtypeStruct((n_pad, 2 * SIZE), jnp.float32),
        scratch_shapes=[
            pltpu.VMEM((n_pad, SIZE), jnp.bfloat16),        # z_children
            pltpu.VMEM((n_pad, 2 * SIZE), jnp.bfloat16),    # [child_sum | z_parent]
        ],
        compiler_params=compiler_params,
    )(feat, c_bf, p_bf, jnp.transpose(w_in), jnp.transpose(w_out))

    h = h_pad[rows_idx]                                          # (N, 2*SIZE), original order

    # ----------------------- per-example packing (glue) -----------------------
    batch_size = len(lengths)
    max_len = max(lengths)
    out_size = 2 * SIZE
    new_h = jnp.zeros((batch_size, max_len, out_size), jnp.float32)
    labels = jnp.zeros((batch_size, max_len), jnp.int32)
    labels_mask = jnp.zeros((batch_size, max_len), bool)
    label_node_ids = jnp.full((batch_size, max_len), -1, jnp.int32)
    off = 0
    for b, n in enumerate(lengths):
        new_h = new_h.at[b, :n].set(h[off:off + n])
        labels = labels.at[b, :n].set(node_tokens[off:off + n])
        labels_mask = labels_mask.at[b, :n].set(True)
        label_node_ids = label_node_ids.at[b, :n].set(node_ids[off:off + n])
        off += n

    # dropout_p = 0 -> nn.Dropout is identity
    return new_h, labels, labels_mask, label_node_ids


# ----------------------- pure-numpy reference (check) -----------------------

def _reference_h_np(params, tree_parents, node_tokens):
    emb_table, w_node, w_in, w_out = (np.asarray(p, np.float32) for p in params)
    children, parent_of, depth, lengths, n = _build_graph(tree_parents)
    toks = np.asarray(node_tokens)
    feat = emb_table[toks] @ w_node.T
    zc = np.zeros((n, SIZE), np.float32)
    ci = np.zeros((n, SIZE), np.float32)
    for v in sorted(range(n), key=lambda u: -depth[u]):          # children first
        if children[v]:
            s = np.sum([zc[c] for c in children[v]], axis=0)
            z_in = np.tanh(s @ w_in.T)
            zc[v] = np.tanh(feat[v] + z_in)
            ci[v] = z_in
        else:
            zc[v] = np.tanh(feat[v])
    zp = np.zeros((n, SIZE), np.float32)
    co = np.zeros((n, SIZE), np.float32)
    for v in sorted(range(n), key=lambda u: depth[u]):           # parents first
        p = parent_of[v]
        if p < 0:
            zp[v] = np.tanh(feat[v])
        else:
            sib = np.sum([zc[c] for c in children[p]], axis=0) - zc[v]
            z_in_o = np.tanh(sib @ w_in.T)
            z_out = np.tanh(zp[p] @ w_out.T + z_in_o)
            zp[v] = np.tanh(feat[v] + z_out)
            co[v] = z_out
    return np.concatenate([ci, co], axis=-1)


# --------------------------------- main -------------------------------------

if __name__ == "__main__":
    key = jax.random.PRNGKey(0)
    k1, k2, k3, k4 = jax.random.split(key, 4)
    emb_table = jax.random.normal(k1, (VOCAB, EMBED_DIM), jnp.float32) * 0.1
    w_node = jax.random.normal(k2, (SIZE, EMBED_DIM), jnp.float32) * 0.1
    w_in = jax.random.normal(k3, (SIZE, SIZE), jnp.float32) * 0.1
    w_out = jax.random.normal(k4, (SIZE, SIZE), jnp.float32) * 0.1
    params = (emb_table, w_node, w_in, w_out)

    # batch of 2 trees (parent index per node, -1 = root):
    #   tree 0: 7-node full binary tree, tree 1: 3-node tree
    tree_parents = [[-1, 0, 0, 1, 1, 2, 2], [-1, 0, 0]]
    total_nodes = sum(len(p) for p in tree_parents)
    node_tokens = jnp.array(np.arange(total_nodes) % VOCAB, jnp.int32)
    node_ids = jnp.array(
        np.concatenate([np.arange(len(p)) for p in tree_parents]), jnp.int32)

    out = tree_encoder_forward(params, tree_parents, node_tokens, node_ids)
    jax.block_until_ready(out)
    output, labels, labels_mask, label_node_ids = out

    assert output.shape == (2, 7, 2 * SIZE)
    assert labels.shape == (2, 7)
    assert labels_mask.shape == (2, 7)
    assert label_node_ids.shape == (2, 7)

    # Numerical check against a pure-numpy f32 reference of the TreeRNN
    # recursion.  The kernel runs the O(Np^2) adjacency matmuls with bf16
    # operands (f32 accumulation), so ~1e-2 is the justified tolerance
    # (tightened from the previous 2e-2; f32-only state would allow ~1e-5).
    h_ref = _reference_h_np(params, tree_parents, node_tokens)
    lengths = [len(p) for p in tree_parents]
    packed_ref = np.zeros((len(lengths), max(lengths), 2 * SIZE), np.float32)
    off = 0
    for b, n in enumerate(lengths):
        packed_ref[b, :n] = h_ref[off:off + n]
        off += n
    np.testing.assert_allclose(np.asarray(output), packed_ref,
                               rtol=1e-2, atol=1e-2)

    print("KERNEL_OK")
</pallas_src>

<mosaic_0001>
module attributes {stable_mosaic.version = 11 : i64} {
  func.func @kernel(%arg0: memref<128x32xf32, #tpu.memory_space<vmem>>, %arg1: memref<128x128xbf16, #tpu.memory_space<vmem>>, %arg2: memref<128x128xbf16, #tpu.memory_space<vmem>>, %arg3: memref<32x32xf32, #tpu.memory_space<vmem>>, %arg4: memref<32x32xf32, #tpu.memory_space<vmem>>, %arg5: memref<128x64xf32, #tpu.memory_space<vmem>>, %arg6: memref<128x32xbf16, #tpu.memory_space<vmem>>, %arg7: memref<128x64xbf16, #tpu.memory_space<vmem>>) attributes {dimension_semantics = [], scalar_prefetch = 0 : i64, scratch_operands = 2 : i64, tpu.core_type = #tpu.core_type<tc>} {
    %c0 = arith.constant 0 : index
    %c0_0 = arith.constant 0 : index
    %0 = vector.load %arg3[%c0, %c0_0] : memref<32x32xf32, #tpu.memory_space<vmem>>, vector<32x32xf32>
    %c0_1 = arith.constant 0 : index
    %c0_2 = arith.constant 0 : index
    %1 = vector.load %arg4[%c0_1, %c0_2] : memref<32x32xf32, #tpu.memory_space<vmem>>, vector<32x32xf32>
    %cst = arith.constant 0.000000e+00 : bf16
    %2 = vector.broadcast %cst : bf16 to vector<128x32xbf16>
    %c0_3 = arith.constant 0 : index
    %c0_4 = arith.constant 0 : index
    %3 = vector.load %arg6[%c0_3, %c0_4] : memref<128x32xbf16, #tpu.memory_space<vmem>>, vector<128x32xbf16>
    tpu.vector_store %arg6[%c0_3, %c0_4], %2 {strides = array<i32>} : memref<128x32xbf16, #tpu.memory_space<vmem>>, vector<128x32xbf16>,
    %cst_5 = arith.constant 0.000000e+00 : bf16
    %4 = vector.broadcast %cst_5 : bf16 to vector<128x64xbf16>
    %c0_6 = arith.constant 0 : index
    %c0_7 = arith.constant 0 : index
    %5 = vector.load %arg7[%c0_6, %c0_7] : memref<128x64xbf16, #tpu.memory_space<vmem>>, vector<128x64xbf16>
    tpu.vector_store %arg7[%c0_6, %c0_7], %4 {strides = array<i32>} : memref<128x64xbf16, #tpu.memory_space<vmem>>, vector<128x64xbf16>,
    %c32 = arith.constant 32 : index
    %c0_8 = arith.constant 0 : index
    %6 = vector.load %arg1[%c32, %c0_8] : memref<128x128xbf16, #tpu.memory_space<vmem>>, vector<16x128xbf16>
    %c0_9 = arith.constant 0 : index
    %c0_10 = arith.constant 0 : index
    %7 = vector.load %arg6[%c0_9, %c0_10] : memref<128x32xbf16, #tpu.memory_space<vmem>>, vector<128x32xbf16>
    %cst_11 = arith.constant dense<0.000000e+00> : vector<16x32xf32>
    %8 = tpu.matmul %6, %7, %cst_11 {dimension_numbers = #tpu.dot_dimension_numbers<[1], [0], [0], [1], [0, 0, 1, 1], [], []>} : vector<16x128xbf16>, vector<128x32xbf16>, vector<16x32xf32> -> vector<16x32xf32>
    %cst_12 = arith.constant dense<0.000000e+00> : vector<16x32xf32>
    %9 = tpu.matmul %8, %0, %cst_12 {dimension_numbers = #tpu.dot_dimension_numbers<[1], [0], [0], [1], [0, 0, 1, 1], [], []>} : vector<16x32xf32>, vector<32x32xf32>, vector<16x32xf32> -> vector<16x32xf32>
    %10 = math.tanh %9 : vector<16x32xf32>
    %c32_13 = arith.constant 32 : index
    %c0_14 = arith.constant 0 : index
    %11 = vector.load %arg0[%c32_13, %c0_14] : memref<128x32xf32, #tpu.memory_space<vmem>>, vector<16x32xf32>
    %12 = arith.addf %11, %10 : vector<16x32xf32>
    %13 = math.tanh %12 : vector<16x32xf32>
    %14 = arith.truncf %13 : vector<16x32xf32> to vector<16x32xbf16>
    %c32_15 = arith.constant 32 : index
    %c0_16 = arith.constant 0 : index
    %15 = vector.load %arg6[%c32_15, %c0_16] : memref<128x32xbf16, #tpu.memory_space<vmem>>, vector<16x32xbf16>
    tpu.vector_store %arg6[%c32_15, %c0_16], %14 {strides = array<i32>} : memref<128x32xbf16, #tpu.memory_space<vmem>>, vector<16x32xbf16>,
    %16 = arith.truncf %8 : vector<16x32xf32> to vector<16x32xbf16>
    %c32_17 = arith.constant 32 : index
    %c0_18 = arith.constant 0 : index
    %17 = vector.load %arg7[%c32_17, %c0_18] : memref<128x64xbf16, #tpu.memory_space<vmem>>, vector<16x32xbf16>
    tpu.vector_store %arg7[%c32_17, %c0_18], %16 {strides = array<i32>} : memref<128x64xbf16, #tpu.memory_space<vmem>>, vector<16x32xbf16>,
    %c32_19 = arith.constant 32 : index
    %c0_20 = arith.constant 0 : index
    %18 = vector.load %arg5[%c32_19, %c0_20] : memref<128x64xf32, #tpu.memory_space<vmem>>, vector<16x32xf32>
    tpu.vector_store %arg5[%c32_19, %c0_20], %10 {strides = array<i32>} : memref<128x64xf32, #tpu.memory_space<vmem>>, vector<16x32xf32>,
    %c16 = arith.constant 16 : index
    %c0_21 = arith.constant 0 : index
    %19 = vector.load %arg1[%c16, %c0_21] : memref<128x128xbf16, #tpu.memory_space<vmem>>, vector<16x128xbf16>
    %c0_22 = arith.constant 0 : index
    %c0_23 = arith.constant 0 : index
    %20 = vector.load %arg6[%c0_22, %c0_23] : memref<128x32xbf16, #tpu.memory_space<vmem>>, vector<128x32xbf16>
    %cst_24 = arith.constant dense<0.000000e+00> : vector<16x32xf32>
    %21 = tpu.matmul %19, %20, %cst_24 {dimension_numbers = #tpu.dot_dimension_numbers<[1], [0], [0], [1], [0, 0, 1, 1], [], []>} : vector<16x128xbf16>, vector<128x32xbf16>, vector<16x32xf32> -> vector<16x32xf32>
    %cst_25 = arith.constant dense<0.000000e+00> : vector<16x32xf32>
    %22 = tpu.matmul %21, %0, %cst_25 {dimension_numbers = #tpu.dot_dimension_numbers<[1], [0], [0], [1], [0, 0, 1, 1], [], []>} : vector<16x32xf32>, vector<32x32xf32>, vector<16x32xf32> -> vector<16x32xf32>
    %23 = math.tanh %22 : vector<16x32xf32>
    %c16_26 = arith.constant 16 : index
    %c0_27 = arith.constant 0 : index
    %24 = vector.load %arg0[%c16_26, %c0_27] : memref<128x32xf32, #tpu.memory_space<vmem>>, vector<16x32xf32>
    %25 = arith.addf %24, %23 : vector<16x32xf32>
    %26 = math.tanh %25 : vector<16x32xf32>
    %27 = arith.truncf %26 : vector<16x32xf32> to vector<16x32xbf16>
    %c16_28 = arith.constant 16 : index
    %c0_29 = arith.constant 0 : index
    %28 = vector.load %arg6[%c16_28, %c0_29] : memref<128x32xbf16, #tpu.memory_space<vmem>>, vector<16x32xbf16>
    tpu.vector_store %arg6[%c16_28, %c0_29], %27 {strides = array<i32>} : memref<128x32xbf16, #tpu.memory_space<vmem>>, vector<16x32xbf16>,
    %29 = arith.truncf %21 : vector<16x32xf32> to vector<16x32xbf16>
    %c16_30 = arith.constant 16 : index
    %c0_31 = arith.constant 0 : index
    %30 = vector.load %arg7[%c16_30, %c0_31] : memref<128x64xbf16, #tpu.memory_space<vmem>>, vector<16x32xbf16>
    tpu.vector_store %arg7[%c16_30, %c0_31], %29 {strides = array<i32>} : memref<128x64xbf16, #tpu.memory_space<vmem>>, vector<16x32xbf16>,
    %c16_32 = arith.constant 16 : index
    %c0_33 = arith.constant 0 : index
    %31 = vector.load %arg5[%c16_32, %c0_33] : memref<128x64xf32, #tpu.memory_space<vmem>>, vector<16x32xf32>
    tpu.vector_store %arg5[%c16_32, %c0_33], %23 {strides = array<i32>} : memref<128x64xf32, #tpu.memory_space<vmem>>, vector<16x32xf32>,
    %c0_34 = arith.constant 0 : index
    %c0_35 = arith.constant 0 : index
    %32 = vector.load %arg1[%c0_34, %c0_35] : memref<128x128xbf16, #tpu.memory_space<vmem>>, vector<16x128xbf16>
    %c0_36 = arith.constant 0 : index
    %c0_37 = arith.constant 0 : index
    %33 = vector.load %arg6[%c0_36, %c0_37] : memref<128x32xbf16, #tpu.memory_space<vmem>>, vector<128x32xbf16>
    %cst_38 = arith.constant dense<0.000000e+00> : vector<16x32xf32>
    %34 = tpu.matmul %32, %33, %cst_38 {dimension_numbers = #tpu.dot_dimension_numbers<[1], [0], [0], [1], [0, 0, 1, 1], [], []>} : vector<16x128xbf16>, vector<128x32xbf16>, vector<16x32xf32> -> vector<16x32xf32>
    %cst_39 = arith.constant dense<0.000000e+00> : vector<16x32xf32>
    %35 = tpu.matmul %34, %0, %cst_39 {dimension_numbers = #tpu.dot_dimension_numbers<[1], [0], [0], [1], [0, 0, 1, 1], [], []>} : vector<16x32xf32>, vector<32x32xf32>, vector<16x32xf32> -> vector<16x32xf32>
    %36 = math.tanh %35 : vector<16x32xf32>
    %c0_40 = arith.constant 0 : index
    %c0_41 = arith.constant 0 : index
    %37 = vector.load %arg0[%c0_40, %c0_41] : memref<128x32xf32, #tpu.memory_space<vmem>>, vector<16x32xf32>
    %38 = arith.addf %37, %36 : vector<16x32xf32>
    %39 = math.tanh %38 : vector<16x32xf32>
    %40 = arith.truncf %39 : vector<16x32xf32> to vector<16x32xbf16>
    %c0_42 = arith.constant 0 : index
    %c0_43 = arith.constant 0 : index
    %41 = vector.load %arg6[%c0_42, %c0_43] : memref<128x32xbf16, #tpu.memory_space<vmem>>, vector<16x32xbf16>
    tpu.vector_store %arg6[%c0_42, %c0_43], %40 {strides = array<i32>} : memref<128x32xbf16, #tpu.memory_space<vmem>>, vector<16x32xbf16>,
    %42 = arith.truncf %34 : vector<16x32xf32> to vector<16x32xbf16>
    %c0_44 = arith.constant 0 : index
    %c0_45 = arith.constant 0 : index
    %43 = vector.load %arg7[%c0_44, %c0_45] : memref<128x64xbf16, #tpu.memory_space<vmem>>, vector<16x32xbf16>
    tpu.vector_store %arg7[%c0_44, %c0_45], %42 {strides = array<i32>} : memref<128x64xbf16, #tpu.memory_space<vmem>>, vector<16x32xbf16>,
    %c0_46 = arith.constant 0 : index
    %c0_47 = arith.constant 0 : index
    %44 = vector.load %arg5[%c0_46, %c0_47] : memref<128x64xf32, #tpu.memory_space<vmem>>, vector<16x32xf32>
    tpu.vector_store %arg5[%c0_46, %c0_47], %36 {strides = array<i32>} : memref<128x64xf32, #tpu.memory_space<vmem>>, vector<16x32xf32>,
    %c0_48 = arith.constant 0 : index
    %c0_49 = arith.constant 0 : index
    %45 = vector.load %arg0[%c0_48, %c0_49] : memref<128x32xf32, #tpu.memory_space<vmem>>, vector<16x32xf32>
    %46 = math.tanh %45 : vector<16x32xf32>
    %47 = arith.truncf %46 : vector<16x32xf32> to vector<16x32xbf16>
    %c0_50 = arith.constant 0 : index
    %c32_51 = arith.constant 32 : index
    %48 = vector.load %arg7[%c0_50, %c32_51] : memref<128x64xbf16, #tpu.memory_space<vmem>>, vector<16x32xbf16>
    tpu.vector_store %arg7[%c0_50, %c32_51], %47 {strides = array<i32>} : memref<128x64xbf16, #tpu.memory_space<vmem>>, vector<16x32xbf16>,
    %cst_52 = arith.constant 0.000000e+00 : f32
    %49 = vector.broadcast %cst_52 : f32 to vector<16x32xf32>
    %c0_53 = arith.constant 0 : index
    %c32_54 = arith.constant 32 : index
    %50 = vector.load %arg5[%c0_53, %c32_54] : memref<128x64xf32, #tpu.memory_space<vmem>>, vector<16x32xf32>
    tpu.vector_store %arg5[%c0_53, %c32_54], %49 {strides = array<i32>} : memref<128x64xf32, #tpu.memory_space<vmem>>, vector<16x32xf32>,
    %c16_55 = arith.constant 16 : index
    %c0_56 = arith.constant 0 : index
    %51 = vector.load %arg2[%c16_55, %c0_56] : memref<128x128xbf16, #tpu.memory_space<vmem>>, vector<16x128xbf16>
    %c0_57 = arith.constant 0 : index
    %c0_58 = arith.constant 0 : index
    %52 = vector.load %arg7[%c0_57, %c0_58] : memref<128x64xbf16, #tpu.memory_space<vmem>>, vector<128x64xbf16>
    %cst_59 = arith.constant dense<0.000000e+00> : vector<16x64xf32>
    %53 = tpu.matmul %51, %52, %cst_59 {dimension_numbers = #tpu.dot_dimension_numbers<[1], [0], [0], [1], [0, 0, 1, 1], [], []>} : vector<16x128xbf16>, vector<128x64xbf16>, vector<16x64xf32> -> vector<16x64xf32>
    %54 = vector.extract_strided_slice %53 {offsets = [0, 0], sizes = [16, 32], strides = [1, 1]} : vector<16x64xf32> to vector<16x32xf32>
    %55 = vector.extract_strided_slice %53 {offsets = [0, 32], sizes = [16, 32], strides = [1, 1]} : vector<16x64xf32> to vector<16x32xf32>
    %c16_60 = arith.constant 16 : index
    %c0_61 = arith.constant 0 : index
    %56 = vector.load %arg6[%c16_60, %c0_61] : memref<128x32xbf16, #tpu.memory_space<vmem>>, vector<16x32xbf16>
    %57 = arith.extf %56 : vector<16x32xbf16> to vector<16x32xf32>
    %58 = arith.subf %54, %57 : vector<16x32xf32>
    %cst_62 = arith.constant dense<0.000000e+00> : vector<16x32xf32>
    %59 = tpu.matmul %58, %0, %cst_62 {dimension_numbers = #tpu.dot_dimension_numbers<[1], [0], [0], [1], [0, 0, 1, 1], [], []>} : vector<16x32xf32>, vector<32x32xf32>, vector<16x32xf32> -> vector<16x32xf32>
    %60 = math.tanh %59 : vector<16x32xf32>
    %cst_63 = arith.constant dense<0.000000e+00> : vector<16x32xf32>
    %61 = tpu.matmul %55, %1, %cst_63 {dimension_numbers = #tpu.dot_dimension_numbers<[1], [0], [0], [1], [0, 0, 1, 1], [], []>} : vector<16x32xf32>, vector<32x32xf32>, vector<16x32xf32> -> vector<16x32xf32>
    %62 = arith.addf %61, %60 : vector<16x32xf32>
    %63 = math.tanh %62 : vector<16x32xf32>
    %c16_64 = arith.constant 16 : index
    %c0_65 = arith.constant 0 : index
    %64 = vector.load %arg0[%c16_64, %c0_65] : memref<128x32xf32, #tpu.memory_space<vmem>>, vector<16x32xf32>
    %65 = arith.addf %64, %63 : vector<16x32xf32>
    %66 = math.tanh %65 : vector<16x32xf32>
    %67 = arith.truncf %66 : vector<16x32xf32> to vector<16x32xbf16>
    %c16_66 = arith.constant 16 : index
    %c32_67 = arith.constant 32 : index
    %68 = vector.load %arg7[%c16_66, %c32_67] : memref<128x64xbf16, #tpu.memory_space<vmem>>, vector<16x32xbf16>
    tpu.vector_store %arg7[%c16_66, %c32_67], %67 {strides = array<i32>} : memref<128x64xbf16, #tpu.memory_space<vmem>>, vector<16x32xbf16>,
    %c16_68 = arith.constant 16 : index
    %c32_69 = arith.constant 32 : index
    %69 = vector.load %arg5[%c16_68, %c32_69] : memref<128x64xf32, #tpu.memory_space<vmem>>, vector<16x32xf32>
    tpu.vector_store %arg5[%c16_68, %c32_69], %63 {strides = array<i32>} : memref<128x64xf32, #tpu.memory_space<vmem>>, vector<16x32xf32>,
    %c32_70 = arith.constant 32 : index
    %c0_71 = arith.constant 0 : index
    %70 = vector.load %arg2[%c32_70, %c0_71] : memref<128x128xbf16, #tpu.memory_space<vmem>>, vector<16x128xbf16>
    %c0_72 = arith.constant 0 : index
    %c0_73 = arith.constant 0 : index
    %71 = vector.load %arg7[%c0_72, %c0_73] : memref<128x64xbf16, #tpu.memory_space<vmem>>, vector<128x64xbf16>
    %cst_74 = arith.constant dense<0.000000e+00> : vector<16x64xf32>
    %72 = tpu.matmul %70, %71, %cst_74 {dimension_numbers = #tpu.dot_dimension_numbers<[1], [0], [0], [1], [0, 0, 1, 1], [], []>} : vector<16x128xbf16>, vector<128x64xbf16>, vector<16x64xf32> -> vector<16x64xf32>
    %73 = vector.extract_strided_slice %72 {offsets = [0, 0], sizes = [16, 32], strides = [1, 1]} : vector<16x64xf32> to vector<16x32xf32>
    %74 = vector.extract_strided_slice %72 {offsets = [0, 32], sizes = [16, 32], strides = [1, 1]} : vector<16x64xf32> to vector<16x32xf32>
    %c32_75 = arith.constant 32 : index
    %c0_76 = arith.constant 0 : index
    %75 = vector.load %arg6[%c32_75, %c0_76] : memref<128x32xbf16, #tpu.memory_space<vmem>>, vector<16x32xbf16>
    %76 = arith.extf %75 : vector<16x32xbf16> to vector<16x32xf32>
    %77 = arith.subf %73, %76 : vector<16x32xf32>
    %cst_77 = arith.constant dense<0.000000e+00> : vector<16x32xf32>
    %78 = tpu.matmul %77, %0, %cst_77 {dimension_numbers = #tpu.dot_dimension_numbers<[1], [0], [0], [1], [0, 0, 1, 1], [], []>} : vector<16x32xf32>, vector<32x32xf32>, vector<16x32xf32> -> vector<16x32xf32>
    %79 = math.tanh %78 : vector<16x32xf32>
    %cst_78 = arith.constant dense<0.000000e+00> : vector<16x32xf32>
    %80 = tpu.matmul %74, %1, %cst_78 {dimension_numbers = #tpu.dot_dimension_numbers<[1], [0], [0], [1], [0, 0, 1, 1], [], []>} : vector<16x32xf32>, vector<32x32xf32>, vector<16x32xf32> -> vector<16x32xf32>
    %81 = arith.addf %80, %79 : vector<16x32xf32>
    %82 = math.tanh %81 : vector<16x32xf32>
    %c32_79 = arith.constant 32 : index
    %c0_80 = arith.constant 0 : index
    %83 = vector.load %arg0[%c32_79, %c0_80] : memref<128x32xf32, #tpu.memory_space<vmem>>, vector<16x32xf32>
    %84 = arith.addf %83, %82 : vector<16x32xf32>
    %85 = math.tanh %84 : vector<16x32xf32>
    %86 = arith.truncf %85 : vector<16x32xf32> to vector<16x32xbf16>
    %c32_81 = arith.constant 32 : index
    %c32_82 = arith.constant 32 : index
    %87 = vector.load %arg7[%c32_81, %c32_82] : memref<128x64xbf16, #tpu.memory_space<vmem>>, vector<16x32xbf16>
    tpu.vector_store %arg7[%c32_81, %c32_82], %86 {strides = array<i32>} : memref<128x64xbf16, #tpu.memory_space<vmem>>, vector<16x32xbf16>,
    %c32_83 = arith.constant 32 : index
    %c32_84 = arith.constant 32 : index
    %88 = vector.load %arg5[%c32_83, %c32_84] : memref<128x64xf32, #tpu.memory_space<vmem>>, vector<16x32xf32>
    tpu.vector_store %arg5[%c32_83, %c32_84], %82 {strides = array<i32>} : memref<128x64xf32, #tpu.memory_space<vmem>>, vector<16x32xf32>,
    return
  }
}

</mosaic_0001>

<bundles_post_ra>
// kernel: tpu_custom_call.1
= control target key start
LH: loop header
LB: loop body
LE: loop exit
PB: predicated region body
PF: predicated region fallthrough
CT: control target
= control target key end

     0   :  { %10 = vsyncpa [#allocation5], 0  ;;  %s1210_s21 = smov [#allocation4]   ;;  %s1211_s23 = smov 128   ;;  %s1441_s0 = inlined_call_operand.vmem [shape: f32[128,32], index: 0, kind: input, shape index: {}]   ;;  %s1442_s1 = inlined_call_operand.vmem [shape: bf16[128,128], index: 1, kind: input, shape index: {}]   ;;  %s1443_s2 = inlined_call_operand.vmem [shape: bf16[128,128], index: 2, kind: input, shape index: {}]   ;;  %s1444_s3 = inlined_call_operand.vmem [shape: f32[32,32], index: 3, kind: input, shape index: {}]   ;;  %s1445_s4 = inlined_call_operand.hbm [shape: f32[32,32], index: 4, kind: input, shape index: {}]   ;;  %s1446_s5 = inlined_call_operand.vmem [shape: f32[128,64], index: 5, kind: output, shape index: {}]  }
   0x1   :  { %s23_s20 = sshll.u32 %s1445_s4, 4  ;;  %s25_s22 = sshll.u32 %s1210_s21, 4  ;;  %s24_s20 = int_to_ptr.hbm [resolvable:$true] %s23_s20  ;;  %s26_s22 = int_to_ptr.vmem [resolvable:$true] %s25_s22 }
   0x2   :  { %s1212_s24 = smov 8  }
   0x3   :  { %31 = dma.hbm_to_vmem [thread:$0]  %s24_s20, 512, %s26_s22, [#allocation5], %s1211_s23, %s1211_s23, %s1212_s24  }
   0x4   :  { %1208 = dma.done.wait [#allocation5], 512  }
   0x5   :  { %1209 = vsyncadd [#allocation5], 4294966784  ;;  %vm45_vm0 = vcmask 257024   ;;  %v1213_v0 = vmov 0   ;;  %v40_v2 = vld [vmem:[%s1444_s3 + $0x18] sm:$0xff]  ;;  %v39_v3 = vld [vmem:[%s1444_s3 + $0x10] sm:$0xff] }
   0x6   :  { %60 = vst.msk [vmem:[#allocation2 + $0x38] sm:$0xf] %vm45_vm0, %v1213_v0  ;;  %vm62_vm1 = vcmask 519168   ;;  %184 = vmatpush.msra.mxu1 %v40_v2  ;;  %317 = vmatpush.msra.mxu3 %v40_v2  ;;  %v38_v4 = vld [vmem:[%s1444_s3 + $0x8] sm:$0xff]  ;;  %v1070_v12 = vld [vmem:[%s1442_s1 + $0x10] sm:$0xff]  ;;  %v37_v13 = vld [vmem:[%s1444_s3] sm:$0xff] }
   0x7   :  { %61 = vst.msk [vmem:[#allocation2 + $0x3c] sm:$0xf] %vm45_vm0, %v1213_v0  ;;  %vm165_vm2 = vcmask 261120   ;;  %v1304_v29 = vld [vmem:[%s1441_s0 + $0x20] sm:$0xff]  ;;  %v1314_v33 = vld [vmem:[%s1441_s0 + $0x28] sm:$0xff]  ;;  %v1333_v57 = vld [vmem:[%s1441_s0 + $0x10] sm:$0xff] }
   0x8   :  { %46 = vst.msk [vmem:[#allocation2] sm:$0xf] %vm45_vm0, %v1213_v0  ;;  %185 = vmatpush.msra.mxu1 %v39_v3  ;;  %318 = vmatpush.msra.mxu3 %v39_v3  ;;  %v1079_v44 = vld [vmem:[%s1442_s1 + $0x8] sm:$0xff]  ;;  %v1343_v61 = vld [vmem:[%s1441_s0 + $0x18] sm:$0xff]  ;;  %s1214_s29 = smov 32   ;;  %vm493_vm3 = vcmask 519424  }
   0x9   :  { %47 = vst.msk [vmem:[#allocation2 + $0x4] sm:$0xf] %vm45_vm0, %v1213_v0  ;;  %s1215_s10 = smov 96   ;;  %vm496_vm4 = vcmask 523520  }
   0xa   :  { %48 = vst.msk [vmem:[#allocation2 + $0x8] sm:$0xf] %vm45_vm0, %v1213_v0  ;;  %186 = vmatpush.msra.mxu1 %v38_v4  ;;  %319 = vmatpush.msra.mxu3 %v38_v4 }
   0xb   :  { %49 = vst.msk [vmem:[#allocation2 + $0xc] sm:$0xf] %vm45_vm0, %v1213_v0 }
   0xc   :  { %50 = vst.msk [vmem:[#allocation2 + $0x10] sm:$0xf] %vm45_vm0, %v1213_v0  ;;  %187 = vmatpush.msra.mxu1 %v37_v13  ;;  %320 = vmatpush.msra.mxu3 %v37_v13 }
   0xd   :  { %51 = vst.msk [vmem:[#allocation2 + $0x14] sm:$0xf] %vm45_vm0, %v1213_v0 }
   0xe   :  { %v1078_v1 = vld [vmem:[#allocation2 + $0x38] sm:$0xff]  ;;  %52 = vst.msk [vmem:[#allocation2 + $0x18] sm:$0xf] %vm45_vm0, %v1213_v0  ;;  %450 = vmatpush.msrb.mxu3 %v40_v2 }
   0xf   :  { %53 = vst.msk [vmem:[#allocation2 + $0x1c] sm:$0xf] %vm45_vm0, %v1213_v0  ;;  %151 = vmatpush.bf16.msra.mxu0 %v1078_v1  ;;  %v1087_v18 = vld [vmem:[#allocation2 + $0x38] sm:$0xff]  ;;  %v479_v1 = vld [vmem:[%s1441_s0] sm:$0xff] }
  0x10   :  { %54 = vst.msk [vmem:[#allocation2 + $0x20] sm:$0xf] %vm45_vm0, %v1213_v0  ;;  %v1071_v11 = vld [vmem:[#allocation2] sm:$0xff]  ;;  %451 = vmatpush.msrb.mxu3 %v39_v3  ;;  %v1096_v19 = vld [vmem:[#allocation2 + $0x38] sm:$0xff]  ;;  %285 = vmatpush.bf16.msra.mxu2 %v1087_v18 }
  0x11   :  { %55 = vst.msk [vmem:[#allocation2 + $0x24] sm:$0xf] %vm45_vm0, %v1213_v0  ;;  %418 = vmatpush.bf16.msrb.mxu1 %v1096_v19  ;;  %v1080_v43 = vld [vmem:[#allocation2] sm:$0xff] }
  0x12   :  { %56 = vst.msk [vmem:[#allocation2 + $0x28] sm:$0xf] %vm45_vm0, %v1213_v0  ;;  %v1072_v10 = vld [vmem:[#allocation2 + $0x8] sm:$0xff]  ;;  %452 = vmatpush.msrb.mxu3 %v38_v4 }
  0x13   :  { %57 = vst.msk [vmem:[#allocation2 + $0x2c] sm:$0xf] %vm45_vm0, %v1213_v0  ;;  %v1081_v42 = vld [vmem:[#allocation2 + $0x8] sm:$0xff] }
  0x14   :  { %58 = vst.msk [vmem:[#allocation2 + $0x30] sm:$0xf] %vm45_vm0, %v1213_v0  ;;  %v1073_v9 = vld [vmem:[#allocation2 + $0x10] sm:$0xff]  ;;  %453 = vmatpush.msrb.mxu3 %v37_v13 }
  0x15   :  { %59 = vst.msk [vmem:[#allocation2 + $0x34] sm:$0xf] %vm45_vm0, %v1213_v0 }
  0x16   :  { %67 = vst.msk [vmem:[#allocation3 + $0x10] sm:$0xf] %vm62_vm1, %v1213_v0  ;;  %v1074_v8 = vld [vmem:[#allocation2 + $0x18] sm:$0xff] }
  0x17   :  { %63 = vst.msk [vmem:[#allocation3] sm:$0xf] %vm62_vm1, %v1213_v0  ;;  %v1083_v26 = vld [vmem:[#allocation2 + $0x18] sm:$0xff] }
  0x18   :  { %64 = vst.msk [vmem:[#allocation3 + $0x4] sm:$0xf] %vm62_vm1, %v1213_v0  ;;  %v1075_v7 = vld [vmem:[#allocation2 + $0x20] sm:$0xff]  ;;  %v1092_v27 = vld [vmem:[#allocation2 + $0x18] sm:$0xff] }
  0x19   :  { %65 = vst.msk [vmem:[#allocation3 + $0x8] sm:$0xf] %vm62_vm1, %v1213_v0  ;;  %v1084_v24 = vld [vmem:[#allocation2 + $0x20] sm:$0xff] }
  0x1a   :  { %v1076_v6 = vld [vmem:[#allocation2 + $0x28] sm:$0xff]  ;;  %66 = vst.msk [vmem:[#allocation3 + $0xc] sm:$0xf] %vm62_vm1, %v1213_v0  ;;  %v1093_v25 = vld [vmem:[#allocation2 + $0x20] sm:$0xff] }
  0x1b   :  { %68 = vst.msk [vmem:[#allocation3 + $0x14] sm:$0xf] %vm62_vm1, %v1213_v0  ;;  %v1085_v22 = vld [vmem:[#allocation2 + $0x28] sm:$0xff] }
  0x1c   :  { %v1077_v5 = vld [vmem:[#allocation2 + $0x30] sm:$0xff]  ;;  %69 = vst.msk [vmem:[#allocation3 + $0x18] sm:$0xf] %vm62_vm1, %v1213_v0  ;;  %v1094_v23 = vld [vmem:[#allocation2 + $0x28] sm:$0xff] }
  0x1d   :  { %152 = vmatpush.bf16.msra.mxu0 %v1077_v5  ;;  %70 = vst.msk [vmem:[#allocation3 + $0x1c] sm:$0xf] %vm62_vm1, %v1213_v0  ;;  %v1086_v20 = vld [vmem:[#allocation2 + $0x30] sm:$0xff] }
  0x1e   :  { %71 = vst.msk [vmem:[#allocation3 + $0x20] sm:$0xf] %vm62_vm1, %v1213_v0  ;;  %v1095_v21 = vld [vmem:[#allocation2 + $0x30] sm:$0xff]  ;;  %286 = vmatpush.bf16.msra.mxu2 %v1086_v20 }
  0x1f   :  { %72 = vst.msk [vmem:[#allocation3 + $0x24] sm:$0xf] %vm62_vm1, %v1213_v0  ;;  %419 = vmatpush.bf16.msrb.mxu1 %v1095_v21 }
  0x20   :  { %73 = vst.msk [vmem:[#allocation3 + $0x28] sm:$0xf] %vm62_vm1, %v1213_v0 }
  0x21   :  { %153 = vmatpush.bf16.msra.mxu0 %v1076_v6  ;;  %74 = vst.msk [vmem:[#allocation3 + $0x2c] sm:$0xf] %vm62_vm1, %v1213_v0  ;;  %v1357_v6 = vld [vmem:[%s1441_s0 + $0x8] sm:$0xff] }
  0x22   :  { %75 = vst.msk [vmem:[#allocation3 + $0x30] sm:$0xf] %vm62_vm1, %v1213_v0  ;;  %287 = vmatpush.bf16.msra.mxu2 %v1085_v22 }
  0x23   :  { %76 = vst.msk [vmem:[#allocation3 + $0x34] sm:$0xf] %vm62_vm1, %v1213_v0  ;;  %420 = vmatpush.bf16.msrb.mxu1 %v1094_v23 }
  0x24   :  { %77 = vst.msk [vmem:[#allocation3 + $0x38] sm:$0xf] %vm62_vm1, %v1213_v0  ;;  %v1101_v53 = vld [vmem:[#allocation3 + $0x18] sm:$0xff] }
  0x25   :  { %154 = vmatpush.bf16.msra.mxu0 %v1075_v7  ;;  %78 = vst.msk [vmem:[#allocation3 + $0x3c] sm:$0xf] %vm62_vm1, %v1213_v0 }
  0x26   :  { %288 = vmatpush.bf16.msra.mxu2 %v1084_v24  ;;  %v1102_v52 = vld [vmem:[#allocation3 + $0x20] sm:$0xff] }
  0x27   :  { %421 = vmatpush.bf16.msrb.mxu1 %v1093_v25 }
  0x28   :  { %v1103_v49 = vld [vmem:[#allocation3 + $0x28] sm:$0xff] }
  0x29   :  { %155 = vmatpush.bf16.msra.mxu0 %v1074_v8 }
  0x2a   :  { %289 = vmatpush.bf16.msra.mxu2 %v1083_v26  ;;  %v1104_v48 = vld [vmem:[#allocation3 + $0x30] sm:$0xff]  ;;  %v1097_v26 = vld [vmem:[%s1443_s2 + $0x8] sm:$0xff] }
  0x2b   :  { %422 = vmatpush.bf16.msrb.mxu1 %v1092_v27 }
  0x2c   :  { %v1105_v45 = vld [vmem:[#allocation3 + $0x38] sm:$0xff] }
  0x2d   :  { %156 = vmatpush.bf16.msra.mxu0 %v1073_v9 }
  0x31   :  { %157 = vmatpush.bf16.msra.mxu0 %v1072_v10 }
  0x35   :  { %158 = vmatpush.bf16.msra.mxu0 %v1071_v11  ;;  %v1089_v11 = vld [vmem:[#allocation2] sm:$0xff] }
  0x38   :  { %159 = vmatmul.bf16.vlgmr.msra.gmra.mxu0 %v1070_v12  ;;  %v1114_v12 = vld [vmem:[#allocation3 + $0x38] sm:$0xff] }
  0x39   :  { %609 = vmatpush.msrb.mxu0 %v40_v2 }
  0x3b   :  { %610 = vmatpush.msrb.mxu0 %v39_v3 }
  0x3d   :  { %611 = vmatpush.msrb.mxu0 %v38_v4 }
  0x3f   :  { %612 = vmatpush.msrb.mxu0 %v37_v13 }
  0x41   :  { %795 = vmatpush.msra.mxu0 %v40_v2 }
  0x43   :  { %796 = vmatpush.msra.mxu0 %v39_v3 }
  0x45   :  { %797 = vmatpush.msra.mxu0 %v38_v4 }
  0x47   :  { %798 = vmatpush.msra.mxu0 %v37_v13  ;;  %v1088_v13 = vld [vmem:[%s1442_s1] sm:$0xff] }
  0xb5   :  { %v160_v14 = vpop.f32.mrf.mxu0 }
  0xb6   :  { %v207_v15 = vpack.c.bf16 %v160_v14, %v160_v14  ;;  %912 = vmatmul.msk.f32.vlgmr.msra.gmra.mxu1 %vm165_vm2, %v160_v14  ;;  %v1113_v14 = vld [vmem:[#allocation3 + $0x30] sm:$0xff] }
  0xb8   :  { %209 = vst.msk [vmem:[#allocation3 + $0x10] sm:$0xf] %vm45_vm0, %v207_v15  ;;  %v1112_v15 = vld [vmem:[#allocation3 + $0x28] sm:$0xff] }
  0xbd   :  { %v162_v16 = vpop.f32.mrf.mxu0 }
  0xbe   :  { %v208_v17 = vpack.c.bf16 %v162_v16, %v162_v16  ;;  %913 = vmatmul.msk.f32.gmra.mxu1 %vm165_vm2, %v162_v16  ;;  %v1111_v16 = vld [vmem:[#allocation3 + $0x20] sm:$0xff] }
  0xc0   :  { %210 = vst.msk [vmem:[#allocation3 + $0x14] sm:$0xf] %vm45_vm0, %v208_v17  ;;  %v1110_v17 = vld [vmem:[#allocation3 + $0x18] sm:$0xff] }
  0xc7   :  { %v1100_v54 = vld [vmem:[#allocation3 + $0x10] sm:$0xff] }
  0xc8   :  { %v1109_v18 = vld [vmem:[#allocation3 + $0x10] sm:$0xff] }
 0x133   :  { %v189_v28 = vpop.f32.mrf.mxu1 }
 0x134   :  { %1132 = vtanh.f32 %v189_v28  ;;  %v44_v28 = vld [vmem:[#allocation4 + $0x18] sm:$0xff] }
 0x13a   :  { %v1133_v30 = vpop.eup %1132 }
 0x13b   :  { %v199_v31 = vadd.f32 %v1133_v30, %v1304_v29  ;;  %211 = vst.msk [vmem:[%s1446_s5 + $0x20] sm:$0xff] %vm165_vm2, %v1133_v30  ;;  %v192_v32 = vpop.f32.mrf.mxu1  ;;  %v43_v30 = vld [vmem:[#allocation4 + $0x10] sm:$0xff] }
 0x13c   :  { %1134 = vtanh.f32 %v192_v32  ;;  %v41_v32 = vld [vmem:[#allocation4] sm:$0xff] }
 0x13d   :  { %1136 = vtanh.f32 %v199_v31  ;;  %v42_v31 = vld [vmem:[#allocation4 + $0x8] sm:$0xff] }
 0x142   :  { %v1135_v34 = vpop.eup %1134 }
 0x143   :  { %v1137_v35 = vpop.eup %1136  ;;  %v200_v36 = vadd.f32 %v1135_v34, %v1314_v33  ;;  %212 = vst.msk [vmem:[%s1446_s5 + $0x28] sm:$0xff] %vm165_vm2, %v1135_v34 }
 0x144   :  { %v203_v37 = vpack.c.bf16 %v1137_v35, %v1137_v35 }
 0x145   :  { %1138 = vtanh.f32 %v200_v36 }
 0x146   :  { %205 = vst.msk [vmem:[#allocation2 + $0x10] sm:$0xf] %vm45_vm0, %v203_v37 }
 0x14b   :  { %v1139_v38 = vpop.eup %1138 }
 0x14c   :  { %v204_v39 = vpack.c.bf16 %v1139_v38, %v1139_v38 }
 0x14e   :  { %206 = vst.msk [vmem:[#allocation2 + $0x14] sm:$0xf] %vm45_vm0, %v204_v39 }
 0x155   :  { %v1082_v40 = vld [vmem:[#allocation2 + $0x10] sm:$0xff] }
 0x156   :  { %v1091_v41 = vld [vmem:[#allocation2 + $0x10] sm:$0xff]  ;;  %290 = vmatpush.bf16.msra.mxu2 %v1082_v40 }
 0x157   :  { %423 = vmatpush.bf16.msrb.mxu1 %v1091_v41 }
 0x15a   :  { %291 = vmatpush.bf16.msra.mxu2 %v1081_v42 }
 0x15e   :  { %292 = vmatpush.bf16.msra.mxu2 %v1080_v43 }
 0x161   :  { %293 = vmatmul.bf16.vlgmr.msra.gmra.mxu2 %v1079_v44 }
 0x162   :  { %644 = vmatpush.msrb.mxu2 %v44_v28 }
 0x164   :  { %645 = vmatpush.msrb.mxu2 %v43_v30 }
 0x166   :  { %646 = vmatpush.msrb.mxu2 %v42_v31 }
 0x168   :  { %647 = vmatpush.msrb.mxu2 %v41_v32 }
 0x16a   :  { %830 = vmatpush.msra.mxu2 %v44_v28 }
 0x16c   :  { %831 = vmatpush.msra.mxu2 %v43_v30 }
 0x16e   :  { %832 = vmatpush.msra.mxu2 %v42_v31 }
 0x170   :  { %833 = vmatpush.msra.mxu2 %v41_v32 }
 0x1e4   :  { %v294_v46 = vpop.f32.mrf.mxu2 }
 0x1e5   :  { %v340_v47 = vpack.c.bf16 %v294_v46, %v294_v46  ;;  %950 = vmatmul.msk.f32.vlgmr.msra.gmra.mxu3 %vm165_vm2, %v294_v46 }
 0x1e6   :  { %571 = vmatpush.bf16.msra.mxu3 %v1105_v45 }
 0x1e7   :  { %342 = vst.msk [vmem:[#allocation3 + $0x8] sm:$0xf] %vm45_vm0, %v340_v47 }
 0x1ea   :  { %572 = vmatpush.bf16.msra.mxu3 %v1104_v48 }
 0x1ec   :  { %v296_v50 = vpop.f32.mrf.mxu2 }
 0x1ed   :  { %v341_v51 = vpack.c.bf16 %v296_v50, %v296_v50  ;;  %951 = vmatmul.msk.f32.gmra.mxu3 %vm165_vm2, %v296_v50 }
 0x1ee   :  { %573 = vmatpush.bf16.msra.mxu3 %v1103_v49 }
 0x1ef   :  { %343 = vst.msk [vmem:[#allocation3 + $0xc] sm:$0xf] %vm45_vm0, %v341_v51 }
 0x1f2   :  { %574 = vmatpush.bf16.msra.mxu3 %v1102_v52 }
 0x1f6   :  { %575 = vmatpush.bf16.msra.mxu3 %v1101_v53  ;;  %v1099_v55 = vld [vmem:[#allocation3 + $0x8] sm:$0xff] }
 0x1fa   :  { %576 = vmatpush.bf16.msra.mxu3 %v1100_v54 }
 0x1fe   :  { %577 = vmatpush.bf16.msra.mxu3 %v1099_v55 }
 0x268   :  { %v322_v56 = vpop.f32.mrf.mxu3 }
 0x269   :  { %1140 = vtanh.f32 %v322_v56 }
 0x26f   :  { %v1141_v58 = vpop.eup %1140 }
 0x270   :  { %v332_v59 = vadd.f32 %v1141_v58, %v1333_v57  ;;  %344 = vst.msk [vmem:[%s1446_s5 + $0x10] sm:$0xff] %vm165_vm2, %v1141_v58  ;;  %v325_v60 = vpop.f32.mrf.mxu3 }
 0x271   :  { %1142 = vtanh.f32 %v325_v60 }
 0x272   :  { %1144 = vtanh.f32 %v332_v59 }
 0x273   :  { %1146 = vtanh.f32 %v479_v1 }
 0x277   :  { %v1143_v62 = vpop.eup %1142 }
 0x278   :  { %v1145_v63 = vpop.eup %1144  ;;  %v333_v0 = vadd.f32 %v1143_v62, %v1343_v61  ;;  %345 = vst.msk [vmem:[%s1446_s5 + $0x18] sm:$0xff] %vm165_vm2, %v1143_v62 }
 0x279   :  { %v336_v2 = vpack.c.bf16 %v1145_v63, %v1145_v63  ;;  %v1147_v3 = vpop.eup %1146 }
 0x27a   :  { %1148 = vtanh.f32 %v333_v0  ;;  %v483_v5 = vpack.c.bf16 %v1147_v3, %v1147_v3 }
 0x27b   :  { %338 = vst.msk [vmem:[#allocation2 + $0x8] sm:$0xf] %vm45_vm0, %v336_v2  ;;  %1150 = vtanh.f32 %v1357_v6 }
 0x27c   :  { %487 = vrot.lane.b32.xlu0 %v483_v5, %s1214_s29 }
 0x280   :  { %v1149_v4 = vpop.eup %1148 }
 0x281   :  { %v337_v7 = vpack.c.bf16 %v1149_v4, %v1149_v4  ;;  %v1151_v8 = vpop.eup %1150 }
 0x282   :  { %v484_v9 = vpack.c.bf16 %v1151_v8, %v1151_v8 }
 0x283   :  { %339 = vst.msk [vmem:[#allocation2 + $0xc] sm:$0xf] %vm45_vm0, %v337_v7 }
 0x284   :  { %489 = vrot.lane.b32.xlu0 %v484_v9, %s1214_s29 }
 0x28a   :  { %v1090_v10 = vld [vmem:[#allocation2 + $0x8] sm:$0xff] }
 0x28b   :  { %424 = vmatpush.bf16.msrb.mxu1 %v1090_v10  ;;  %v1123_v41 = vld [vmem:[#allocation2 + $0x8] sm:$0xff]   ;;  %v1106_v10 = vld [vmem:[%s1443_s2 + $0x10] sm:$0xff] }
 0x28c   :  { %v1117_v42 = vunpack.c.l.bf16 %v1123_v41  ;;  %v1118_v47 = vunpack.c.h.bf16 %v1123_v41 }
 0x28f   :  { %425 = vmatpush.bf16.msrb.mxu1 %v1089_v11  ;;  %v1124_v11 = vld [vmem:[#allocation2 + $0x10] sm:$0xff]  }
 0x292   :  { %426 = vmatmul.bf16.vlgmr.msrb.gmra.mxu1 %v1088_v13 }
 0x293   :  { %757 = vmatpush.bf16.msra.mxu1 %v1114_v12  ;;  %v1121_v12 = vunpack.c.l.bf16 %v1124_v11 }
 0x297   :  { %758 = vmatpush.bf16.msra.mxu1 %v1113_v14 }
 0x29b   :  { %759 = vmatpush.bf16.msra.mxu1 %v1112_v15  ;;  %v1122_v15 = vunpack.c.h.bf16 %v1124_v11 }
 0x29f   :  { %760 = vmatpush.bf16.msra.mxu1 %v1111_v16 }
 0x2a3   :  { %761 = vmatpush.bf16.msra.mxu1 %v1110_v17 }
 0x2a7   :  { %762 = vmatpush.bf16.msra.mxu1 %v1109_v18 }
 0x2ee   :  { %v488_v19 = vpop.permute.xlu0 %487 }
 0x2f6   :  { %v490_v24 = vpop.permute.xlu0 %489 }
 0x30f   :  { %v427_v20 = vpop.f32.mrf.mxu1 }
 0x310   :  { %v473_v21 = vpack.c.bf16 %v427_v20, %v427_v20  ;;  %988 = vmatmul.msk.f32.vlgmr.msrb.gmra.mxu3 %vm165_vm2, %v427_v20 }
 0x312   :  { %475 = vst.msk [vmem:[#allocation3] sm:$0xf] %vm45_vm0, %v473_v21 }
 0x313   :  { %494 = vst.msk [vmem:[#allocation3] sm:$0xf] %vm493_vm3, %v488_v19 }
 0x317   :  { %v429_v22 = vpop.f32.mrf.mxu1 }
 0x318   :  { %v474_v23 = vpack.c.bf16 %v429_v22, %v429_v22  ;;  %989 = vmatmul.msk.f32.gmra.mxu3 %vm165_vm2, %v429_v22 }
 0x31a   :  { %476 = vst.msk [vmem:[#allocation3 + $0x4] sm:$0xf] %vm45_vm0, %v474_v23 }
 0x31b   :  { %495 = vst.msk [vmem:[#allocation3 + $0x4] sm:$0xf] %vm493_vm3, %v490_v24 }
 0x322   :  { %v1098_v25 = vld [vmem:[#allocation3] sm:$0xff] }
 0x323   :  { %578 = vmatpush.bf16.msra.mxu3 %v1098_v25  ;;  %v1107_v9 = vld [vmem:[#allocation3] sm:$0xff] }
 0x326   :  { %579 = vmatmul.bf16.vlgmr.msra.gmra.mxu3 %v1097_v26 }
 0x393   :  { %v455_v27 = vpop.f32.mrf.mxu3 }
 0x394   :  { %1152 = vtanh.f32 %v455_v27 }
 0x39a   :  { %v1153_v34 = vpop.eup %1152 }
 0x39b   :  { %v465_v35 = vadd.f32 %v1153_v34, %v479_v1  ;;  %477 = vst.msk [vmem:[%s1446_s5] sm:$0xff] %vm165_vm2, %v1153_v34  ;;  %v458_v36 = vpop.f32.mrf.mxu3 }
 0x39c   :  { %1154 = vtanh.f32 %v458_v36 }
 0x39d   :  { %1156 = vtanh.f32 %v465_v35 }
 0x3a2   :  { %v1155_v37 = vpop.eup %1154 }
 0x3a3   :  { %v1157_v38 = vpop.eup %1156  ;;  %v466_v39 = vadd.f32 %v1155_v37, %v1357_v6  ;;  %478 = vst.msk [vmem:[%s1446_s5 + $0x8] sm:$0xff] %vm165_vm2, %v1155_v37  ;;  %v1216_v6 = vmov 0.0  }
 0x3a4   :  { %v469_v40 = vpack.c.bf16 %v1157_v38, %v1157_v38  ;;  %497 = vst.msk [vmem:[%s1446_s5] sm:$0xff] %vm496_vm4, %v1216_v6 }
 0x3a5   :  { %1158 = vtanh.f32 %v466_v39  ;;  %498 = vst.msk [vmem:[%s1446_s5 + $0x8] sm:$0xff] %vm496_vm4, %v1216_v6 }
 0x3a6   :  { %471 = vst.msk [vmem:[#allocation2] sm:$0xf] %vm45_vm0, %v469_v40 }
 0x3a9   :  { %v580_v43 = vpop.f32.mrf.mxu3 }
 0x3aa   :  { %v589_v45 = vsub.f32 %v580_v43, %v1117_v42  ;;  %624 = vrot.lane.b32.xlu1 %v580_v43, %s1215_s10 }
 0x3ab   :  { %v1159_v44 = vpop.eup %1158 }
 0x3ac   :  { %v470_v46 = vpack.c.bf16 %v1159_v44, %v1159_v44  ;;  %1026 = vmatmul.msk.f32.vlgmr.msrb.gmra.mxu0 %vm165_vm2, %v589_v45 }
 0x3ae   :  { %472 = vst.msk [vmem:[#allocation2 + $0x4] sm:$0xf] %vm45_vm0, %v470_v46 }
 0x3b1   :  { %v582_v48 = vpop.f32.mrf.mxu3 }
 0x3b2   :  { %v590_v49 = vsub.f32 %v582_v48, %v1118_v47  ;;  %626 = vrot.lane.b32.xlu1 %v582_v48, %s1215_s10 }
 0x3b4   :  { %1027 = vmatmul.msk.f32.gmra.mxu0 %vm165_vm2, %v590_v49 }
 0x41c   :  { %v625_v50 = vpop.permute.xlu1 %624 }
 0x41d   :  { %1028 = vmatmul.msk.f32.vlgmr.msrb.gmra.mxu2 %vm165_vm2, %v625_v50 }
 0x424   :  { %v627_v51 = vpop.permute.xlu1 %626 }
 0x425   :  { %1029 = vmatmul.msk.f32.gmra.mxu2 %vm165_vm2, %v627_v51 }
 0x429   :  { %v614_v52 = vpop.f32.mrf.mxu0 }
 0x42a   :  { %1160 = vtanh.f32 %v614_v52 }
 0x430   :  { %v1161_v54 = vpop.eup %1160 }
 0x431   :  { %v617_v53 = vpop.f32.mrf.mxu0 }
 0x432   :  { %1162 = vtanh.f32 %v617_v53 }
 0x438   :  { %v1163_v58 = vpop.eup %1162 }
 0x4a0   :  { %v649_v55 = vpop.f32.mrf.mxu2 }
 0x4a1   :  { %v650_v56 = vadd.f32 %v1161_v54, %v649_v55 }
 0x4a3   :  { %1164 = vtanh.f32 %v650_v56 }
 0x4a8   :  { %v652_v59 = vpop.f32.mrf.mxu2 }
 0x4a9   :  { %v1165_v60 = vpop.eup %1164  ;;  %v653_v62 = vadd.f32 %v1163_v58, %v652_v59 }
 0x4aa   :  { %v659_v63 = vadd.f32 %v1165_v60, %v1333_v57 }
 0x4ab   :  { %1166 = vtanh.f32 %v653_v62 }
 0x4ac   :  { %1168 = vtanh.f32 %v659_v63 }
 0x4b1   :  { %v1167_v0 = vpop.eup %1166 }
 0x4b2   :  { %v1169_v1 = vpop.eup %1168  ;;  %v660_v2 = vadd.f32 %v1167_v0, %v1343_v61 }
 0x4b3   :  { %v663_v3 = vpack.c.bf16 %v1169_v1, %v1169_v1 }
 0x4b4   :  { %1170 = vtanh.f32 %v660_v2 }
 0x4b5   :  { %667 = vrot.lane.b32.xlu2 %v663_v3, %s1214_s29 }
 0x4ba   :  { %v1171_v4 = vpop.eup %1170 }
 0x4bb   :  { %v664_v5 = vpack.c.bf16 %v1171_v4, %v1171_v4 }
 0x4bd   :  { %669 = vrot.lane.b32.xlu2 %v664_v5, %s1214_s29 }
 0x4c5   :  { %677 = vrot.lane.b32.xlu2 %v1165_v60, %s1214_s29 }
 0x50f   :  { %v668_v57 = vpop.permute.xlu2 %667 }
 0x510   :  { %673 = vst.msk [vmem:[#allocation3 + $0x8] sm:$0xf] %vm493_vm3, %v668_v57 }
 0x517   :  { %v670_v61 = vpop.permute.xlu2 %669 }
 0x518   :  { %674 = vst.msk [vmem:[#allocation3 + $0xc] sm:$0xf] %vm493_vm3, %v670_v61 }
 0x51f   :  { %v678_v7 = vpop.permute.xlu2 %677  ;;  %v1108_v8 = vld [vmem:[#allocation3 + $0x8] sm:$0xff] }
 0x520   :  { %683 = vst.msk [vmem:[%s1446_s5 + $0x10] sm:$0xff] %vm496_vm4, %v678_v7  ;;  %763 = vmatpush.bf16.msra.mxu1 %v1108_v8 }
 0x524   :  { %764 = vmatpush.bf16.msra.mxu1 %v1107_v9 }
 0x527   :  { %765 = vmatmul.bf16.vlgmr.msra.gmra.mxu1 %v1106_v10 }
 0x5a4   :  { %v766_v13 = vpop.f32.mrf.mxu1 }
 0x5a5   :  { %v775_v14 = vsub.f32 %v766_v13, %v1121_v12  ;;  %810 = vrot.lane.b32.xlu0 %v766_v13, %s1215_s10 }
 0x5a7   :  { %1066 = vmatmul.msk.f32.vlgmr.msra.gmra.mxu0 %vm165_vm2, %v775_v14 }
 0x5ac   :  { %v768_v16 = vpop.f32.mrf.mxu1 }
 0x5ad   :  { %v776_v17 = vsub.f32 %v768_v16, %v1122_v15  ;;  %679 = vrot.lane.b32.xlu0 %v1167_v0, %s1214_s29  ;;  %812 = vrot.lane.b32.xlu1 %v768_v16, %s1215_s10 }
 0x5af   :  { %1067 = vmatmul.msk.f32.gmra.mxu0 %vm165_vm2, %v776_v17 }
 0x617   :  { %v811_v18 = vpop.permute.xlu0 %810 }
 0x618   :  { %1068 = vmatmul.msk.f32.vlgmr.msra.gmra.mxu2 %vm165_vm2, %v811_v18 }
 0x61f   :  { %v680_v19 = vpop.permute.xlu0 %679  ;;  %v813_v20 = vpop.permute.xlu1 %812 }
 0x620   :  { %684 = vst.msk [vmem:[%s1446_s5 + $0x18] sm:$0xff] %vm496_vm4, %v680_v19  ;;  %1069 = vmatmul.msk.f32.gmra.mxu2 %vm165_vm2, %v813_v20 }
 0x624   :  { %v800_v21 = vpop.f32.mrf.mxu0 }
 0x625   :  { %1172 = vtanh.f32 %v800_v21 }
 0x62b   :  { %v1173_v23 = vpop.eup %1172 }
 0x62c   :  { %v803_v22 = vpop.f32.mrf.mxu0 }
 0x62d   :  { %1174 = vtanh.f32 %v803_v22 }
 0x633   :  { %v1175_v26 = vpop.eup %1174 }
 0x69b   :  { %v835_v24 = vpop.f32.mrf.mxu2 }
 0x69c   :  { %v836_v25 = vadd.f32 %v1173_v23, %v835_v24 }
 0x69e   :  { %1176 = vtanh.f32 %v836_v25 }
 0x6a3   :  { %v838_v27 = vpop.f32.mrf.mxu2 }
 0x6a4   :  { %v1177_v28 = vpop.eup %1176  ;;  %v839_v30 = vadd.f32 %v1175_v26, %v838_v27 }
 0x6a5   :  { %863 = vrot.lane.b32.xlu0 %v1177_v28, %s1214_s29  ;;  %v845_v31 = vadd.f32 %v1177_v28, %v1304_v29 }
 0x6a6   :  { %1178 = vtanh.f32 %v839_v30 }
 0x6a7   :  { %1180 = vtanh.f32 %v845_v31 }
 0x6ac   :  { %v1179_v32 = vpop.eup %1178 }
 0x6ad   :  { %v1181_v34 = vpop.eup %1180  ;;  %v846_v35 = vadd.f32 %v1179_v32, %v1314_v33 }
 0x6ae   :  { %v849_v36 = vpack.c.bf16 %v1181_v34, %v1181_v34 }
 0x6af   :  { %1182 = vtanh.f32 %v846_v35 }
 0x6b0   :  { %853 = vrot.lane.b32.xlu1 %v849_v36, %s1214_s29 }
 0x6b5   :  { %v1183_v37 = vpop.eup %1182 }
 0x6b6   :  { %v850_v38 = vpack.c.bf16 %v1183_v37, %v1183_v37 }
 0x6b8   :  { %865 = vrot.lane.b32.xlu1 %v1179_v32, %s1214_s29  ;;  %855 = vrot.lane.b32.xlu2 %v850_v38, %s1214_s29 }
 0x712   :  { %v856_v39 = vpop.permute.xlu2 %855 }
 0x713   :  { %860 = vst.msk [vmem:[#allocation3 + $0x14] sm:$0xf] %vm493_vm3, %v856_v39 }
 0x717   :  { %v864_v29 = vpop.permute.xlu0 %863 }
 0x718   :  { %869 = vst.msk [vmem:[%s1446_s5 + $0x20] sm:$0xff] %vm496_vm4, %v864_v29 }
 0x722   :  { %v854_v33 = vpop.permute.xlu1 %853 }
 0x723   :  { %859 = vst.msk [vmem:[#allocation3 + $0x10] sm:$0xf] %vm493_vm3, %v854_v33 }
 0x72a   :  { %v866_v40 = vpop.permute.xlu1 %865 }
 0x72b   :  { %870 = vst.msk [vmem:[%s1446_s5 + $0x28] sm:$0xff] %vm496_vm4, %v866_v40 }
 0x72c   :  { %875 = vsyncpa [#allocation5], 1 }

</bundles_post_ra>
